<compile_context>
chip_gen: v7x
topology: tpu7x:2x2x1
jax: 0.10.0
libtpu: 0.0.40
codegen_flags: <defaults>
</compile_context>

<pallas_src>
import jax
import jax.numpy as jnp
from jax.experimental import pallas as pl
from jax.experimental.pallas import tpu as pltpu


def _round_up(n, m):
    return ((n + m - 1) // m) * m


def _vmem_budget():
    """(total live-block budget, VMEM capacity) in bytes, per chip generation."""
    try:
        cap = int(pltpu.get_tpu_info().vmem_capacity_bytes)
    except Exception:
        cap = 64 << 20                      # unknown -> assume v7x per-TC VMEM
    # Live block data ~= 2x(input) + 2x(output) double buffers; keep ample
    # headroom for Mosaic scratch on every generation (v5e/v6e 128 MiB, v7x 64).
    return min(cap // 3, 24 << 20), cap


def _plan(B, d, T, itemsize):
    """Pick block mode / batch-block / time-tile for the current chip."""
    total_budget, vmem_cap = _vmem_budget()
    block_budget = total_budget // 4        # one block, one buffer
    sub = max(8, 32 // itemsize)            # sublane tile: 8 (f32) / 16 (bf16)
    d_pad = _round_up(d, sub)
    T_p128 = _round_up(T, 128)
    per_batch_fullT = 3 * d_pad * T_p128 * itemsize   # VMEM footprint / batch elem

    if per_batch_fullT <= block_budget and (B > 1 or T_p128 < 256):
        # Full-T blocks fit: in-kernel mean; block batch elements per grid step
        # so each step moves ~1-4 MiB (amortizes per-step overhead).
        target = min(block_budget, 4 << 20)
        bb = 1
        for cand in range(min(B, 8), 0, -1):
            if B % cand:
                continue
            if cand > 1 and cand * per_batch_fullT > target:
                continue
            if B > 1 and B // cand < 2:
                continue                    # keep >=2 grid blocks (v7x: 2 TCs)
            bb = cand
            break
        return dict(mode="full", bb=bb, t_tile=T,
                    block_bytes=bb * per_batch_fullT, vmem_cap=vmem_cap)

    # Tiled-T path: full-T doesn't fit the per-chip budget (large d*T), or B==1
    # with a long T (split T so both v7x TensorCores get work).  mean(y over T)
    # is hoisted to the wrapper so the T grid axis stays fully parallel.
    n128 = T_p128 // 128
    per_128 = 3 * d_pad * 128 * itemsize
    max_mult = max(1, min(n128, block_budget // max(per_128, 1)))
    if B == 1:
        max_mult = min(max_mult, max(1, n128 // 2))   # >=2 T tiles when possible
    mult = 1
    for m in range(max_mult, 0, -1):        # largest 128-multiple dividing T_p128
        if n128 % m == 0:
            mult = m
            break
    t_tile = 128 * mult
    return dict(mode="tiled", bb=1, t_tile=t_tile,
                block_bytes=3 * d_pad * t_tile * itemsize, vmem_cap=vmem_cap)


def _compiler_params(dims, block_bytes, vmem_cap):
    kwargs = dict(dimension_semantics=dims)
    needed = 4 * block_bytes + (2 << 20)    # 2x in + 2x out buffers + slack
    if needed > (16 << 20):                 # above the smallest (v5e) default limit
        kwargs["vmem_limit_bytes"] = int(min(max(needed, 32 << 20),
                                             vmem_cap - (8 << 20)))
    return pltpu.CompilerParams(**kwargs)


def _component_math(y, w, y3, mean, cci_t):
    """Per-(d, Tt) slab math (f32). Returns (rep1, intensity, y3 - rep1)."""
    # Channel softmax (sublane axis) sharing a single full-size exp.
    w_max = jnp.max(w, axis=0, keepdims=True)              # (1, Tt) XLU reduce
    e_w = jnp.exp(w - w_max)                                # (d, Tt) EUP
    inv = pl.reciprocal(jnp.sum(e_w, axis=0, keepdims=True), approx=False)
    sm = e_w * inv
    # Direct exp(w): numerically identical to torch.exp(w) (no 0*inf hazard).
    intensity = jnp.exp(w)
    weighted = sm * (y - mean)                              # (d, Tt)
    # rep1[j, t] = sum_i cci[i, j] * weighted[i, t] = (cci^T @ weighted)[j, t]
    rep1 = jnp.dot(cci_t, weighted, preferred_element_type=jnp.float32) + mean
    return rep1, intensity, y3 - rep1


def _cross_interp_kernel_fullT(x_ref, cci_ref, o_ref):
    """Full-time-extent block; mean(y over T) computed in-kernel.

    x_ref/o_ref: (Bb, 3, d, T)   cci_ref: (d, d) pre-transposed.
    """
    bb = x_ref.shape[0]
    cci_t = cci_ref[...].astype(jnp.float32)
    for b in range(bb):                      # static unroll over the batch block
        y = x_ref[b, 0].astype(jnp.float32)
        w = x_ref[b, 1].astype(jnp.float32)
        y3 = x_ref[b, 2].astype(jnp.float32)
        mean = jnp.mean(y, axis=1, keepdims=True)           # (d, 1) lane reduce
        rep1, intensity, y3m = _component_math(y, w, y3, mean, cci_t)
        o_ref[b, 0] = rep1.astype(o_ref.dtype)
        o_ref[b, 1] = intensity.astype(o_ref.dtype)
        o_ref[b, 2] = y3m.astype(o_ref.dtype)


def _cross_interp_kernel_tiledT(x_ref, mean_ref, cci_ref, o_ref):
    """Time-tiled block; mean(y over T) hoisted to the wrapper.

    x_ref/o_ref: (1, 3, d, Tt)   mean_ref: (1, d, 1)   cci_ref: (d, d).
    """
    cci_t = cci_ref[...].astype(jnp.float32)
    y = x_ref[0, 0].astype(jnp.float32)
    w = x_ref[0, 1].astype(jnp.float32)
    y3 = x_ref[0, 2].astype(jnp.float32)
    mean = mean_ref[0].astype(jnp.float32)                  # (d, 1)
    rep1, intensity, y3m = _component_math(y, w, y3, mean, cci_t)
    o_ref[0, 0] = rep1.astype(o_ref.dtype)
    o_ref[0, 1] = intensity.astype(o_ref.dtype)
    o_ref[0, 2] = y3m.astype(o_ref.dtype)


def cross_interp_forward(x, cross_channel_interp):
    """x: (B, 3*d, T); cross_channel_interp: (d, d).

    Returns (B, 3*d, T), matching Cross_Interp.forward(x, reconstruction=False).
    """
    B, C, T = x.shape
    d = cross_channel_interp.shape[0]
    assert C == 3 * d, f"expected 3*d={3 * d} channels, got {C}"

    plan = _plan(B, d, T, jnp.dtype(x.dtype).itemsize)
    # Free (row-major) reshape: components become a size-3 leading axis, so every
    # (d, T) slab the kernel touches starts at sublane 0 even when d % 8 != 0.
    x4 = x.reshape(B, 3, d, T)
    # Tiny matrix, pre-transposed so the NCT contraction is a single jnp.dot.
    cci_t = jnp.transpose(cross_channel_interp).astype(jnp.float32)

    if plan["mode"] == "full":
        bb = plan["bb"]
        out4 = pl.pallas_call(
            _cross_interp_kernel_fullT,
            out_shape=jax.ShapeDtypeStruct((B, 3, d, T), x.dtype),
            grid_spec=pltpu.PrefetchScalarGridSpec(
                num_scalar_prefetch=0,
                grid=(B // bb,),
                in_specs=[
                    pl.BlockSpec((bb, 3, d, T), lambda i: (i, 0, 0, 0)),
                    pl.BlockSpec((d, d), lambda i: (0, 0)),
                ],
                out_specs=pl.BlockSpec((bb, 3, d, T), lambda i: (i, 0, 0, 0)),
            ),
            compiler_params=_compiler_params(("parallel",),
                                             plan["block_bytes"],
                                             plan["vmem_cap"]),
        )(x4, cci_t)
        return out4.reshape(B, 3 * d, T)

    # Tiled-T path.
    t_tile = plan["t_tile"]
    # Hoisted time-mean of y (one read of 1/3 of x); keeps the T axis parallel.
    mean_y = jnp.mean(x4[:, 0], axis=-1, keepdims=True)     # (B, d, 1)
    T_pad = _round_up(T, t_tile)
    if T_pad != T:
        # Lane-align T (zeros are benign: exp(0)=1, finite softmax); padded
        # columns are sliced off below.  A cdiv grid with a masked last tile
        # would avoid this extra pad copy — possible future optimization.
        x4 = jnp.pad(x4, ((0, 0), (0, 0), (0, 0), (0, T_pad - T)))
    # TODO(synk): for very large d (Tt stuck at 128-256), sweep
    # pipeline_mode=pl.Buffered(3) on the x/out BlockSpecs to hide DMA latency.
    out4 = pl.pallas_call(
        _cross_interp_kernel_tiledT,
        out_shape=jax.ShapeDtypeStruct((B, 3, d, T_pad), x.dtype),
        grid_spec=pltpu.PrefetchScalarGridSpec(
            num_scalar_prefetch=0,
            grid=(B, T_pad // t_tile),
            in_specs=[
                pl.BlockSpec((1, 3, d, t_tile), lambda b, t: (b, 0, 0, t)),
                pl.BlockSpec((1, d, 1), lambda b, t: (b, 0, 0)),
                pl.BlockSpec((d, d), lambda b, t: (0, 0)),
            ],
            out_specs=pl.BlockSpec((1, 3, d, t_tile), lambda b, t: (b, 0, 0, t)),
        ),
        compiler_params=_compiler_params(("parallel", "parallel"),
                                         plan["block_bytes"],
                                         plan["vmem_cap"]),
    )(x4, mean_y, cci_t)
    out = out4.reshape(B, 3 * d, T_pad)
    return out[:, :, :T] if T_pad != T else out


def _reference_forward(x_nct, cci):
    """Pure-JAX reference mirroring the PyTorch code line-by-line."""
    d = cci.shape[0]
    y = x_nct[:, :d, :]
    w = x_nct[:, d:2 * d, :]
    intensity = jnp.exp(w)
    y = jnp.transpose(y, (0, 2, 1))
    w = jnp.transpose(w, (0, 2, 1))
    den = jax.scipy.special.logsumexp(w, axis=2, keepdims=True)
    sm = jnp.exp(w - den)
    mean = jnp.mean(y, axis=1, keepdims=True)
    w2 = jnp.matmul(sm * (y - mean), cci) + mean
    rep1 = jnp.transpose(w2, (0, 2, 1))
    y_trans = x_nct[:, 2 * d:3 * d, :] - rep1
    return jnp.concatenate([rep1, intensity, y_trans], axis=1)


if __name__ == "__main__":
    key = jax.random.PRNGKey(0)
    k1, k2, k3 = jax.random.split(key, 3)
    d = 4
    cci = jnp.eye(d, dtype=jnp.float32)          # nn.init.eye_ on (d, d)

    # 1) Small shapes consistent with the module: B=2, d_dim=4, T=16 -> (2,12,16)
    x = jax.random.normal(k1, (2, 3 * d, 16), dtype=jnp.float32)
    out = jax.block_until_ready(cross_interp_forward(x, cci))
    assert out.shape == (2, 3 * d, 16)
    assert jnp.allclose(out, _reference_forward(x, cci), atol=1e-5, rtol=1e-5)

    # 2) Exercise the batch-blocked full-T kernel path (Bb > 1).
    x_b = jax.random.normal(k2, (4, 3 * d, 16), dtype=jnp.float32)
    out_b = jax.block_until_ready(cross_interp_forward(x_b, cci))
    assert jnp.allclose(out_b, _reference_forward(x_b, cci), atol=1e-5, rtol=1e-5)

    # 3) Exercise the time-tiled path (B=1, long & non-128-multiple T -> padded
    #    lane tiles, hoisted mean, >=2 parallel T blocks for dual-TC chips).
    x_t = jax.random.normal(k3, (1, 3 * d, 300), dtype=jnp.float32)
    out_t = jax.block_until_ready(cross_interp_forward(x_t, cci))
    assert out_t.shape == (1, 3 * d, 300)
    assert jnp.allclose(out_t, _reference_forward(x_t, cci), atol=1e-5, rtol=1e-5)

    # TODO(synk): reconstruction=True path (returns rep1 only, shape (B, d, T))
    # is not wired; only the default reconstruction=False forward is implemented.
    print("KERNEL_OK")
</pallas_src>

<mosaic_0001>
module attributes {stable_mosaic.version = 11 : i64} {
  func.func @_cross_interp_kernel_fullT(%arg0: i32, %arg1: memref<1x3x4x16xf32, #tpu.memory_space<vmem>>, %arg2: memref<4x4xf32, #tpu.memory_space<vmem>>, %arg3: memref<1x3x4x16xf32, #tpu.memory_space<vmem>>) attributes {dimension_semantics = [#tpu.dimension_semantics<parallel>], iteration_bounds = array<i64: 2>, scalar_prefetch = 0 : i64, scratch_operands = 0 : i64, tpu.core_type = #tpu.core_type<tc>, window_params = [{transform_indices = @transform_0, window_bounds = array<i64: 1, 3, 4, 16>}, {pipeline_mode = #tpu.pipeline_mode<synchronous>, transform_indices = @transform_1, window_bounds = array<i64: 4, 4>}, {transform_indices = @transform_2, window_bounds = array<i64: 1, 3, 4, 16>}]} {
    %c0 = arith.constant 0 : index
    %c0_0 = arith.constant 0 : index
    %0 = vector.load %arg2[%c0, %c0_0] : memref<4x4xf32, #tpu.memory_space<vmem>>, vector<4x4xf32>
    %c0_1 = arith.constant 0 : index
    %c0_2 = arith.constant 0 : index
    %c0_3 = arith.constant 0 : index
    %c0_4 = arith.constant 0 : index
    %1 = vector.load %arg1[%c0_1, %c0_2, %c0_3, %c0_4] : memref<1x3x4x16xf32, #tpu.memory_space<vmem>>, vector<1x1x4x16xf32>
    %2 = vector.shape_cast %1 : vector<1x1x4x16xf32> to vector<4x16xf32>
    %c0_5 = arith.constant 0 : index
    %c1 = arith.constant 1 : index
    %c0_6 = arith.constant 0 : index
    %c0_7 = arith.constant 0 : index
    %3 = vector.load %arg1[%c0_5, %c1, %c0_6, %c0_7] : memref<1x3x4x16xf32, #tpu.memory_space<vmem>>, vector<1x1x4x16xf32>
    %4 = vector.shape_cast %3 : vector<1x1x4x16xf32> to vector<4x16xf32>
    %c0_8 = arith.constant 0 : index
    %c2 = arith.constant 2 : index
    %c0_9 = arith.constant 0 : index
    %c0_10 = arith.constant 0 : index
    %5 = vector.load %arg1[%c0_8, %c2, %c0_9, %c0_10] : memref<1x3x4x16xf32, #tpu.memory_space<vmem>>, vector<1x1x4x16xf32>
    %6 = vector.shape_cast %5 : vector<1x1x4x16xf32> to vector<4x16xf32>
    %cst = arith.constant dense<0.000000e+00> : vector<4xf32>
    %7 = vector.multi_reduction <add>, %2, %cst [1] : vector<4x16xf32> to vector<4xf32>
    %8 = vector.shape_cast %7 : vector<4xf32> to vector<4x1xf32>
    %cst_11 = arith.constant 1.600000e+01 : f32
    %9 = vector.broadcast %cst_11 : f32 to vector<4x1xf32>
    %10 = arith.divf %8, %9 : vector<4x1xf32>
    %cst_12 = arith.constant dense<0xFF800000> : vector<16xf32>
    %11 = vector.multi_reduction <maximumf>, %4, %cst_12 [0] : vector<4x16xf32> to vector<16xf32>
    %12 = vector.shape_cast %11 : vector<16xf32> to vector<1x16xf32>
    %13 = vector.broadcast %12 : vector<1x16xf32> to vector<4x16xf32>
    %14 = arith.subf %4, %13 : vector<4x16xf32>
    %15 = math.exp %14 : vector<4x16xf32>
    %cst_13 = arith.constant dense<0.000000e+00> : vector<16xf32>
    %16 = vector.multi_reduction <add>, %15, %cst_13 [0] : vector<4x16xf32> to vector<16xf32>
    %17 = vector.shape_cast %16 : vector<16xf32> to vector<1x16xf32>
    %18 = tpu.reciprocal %17 : vector<1x16xf32> -> vector<1x16xf32>
    %19 = vector.broadcast %18 : vector<1x16xf32> to vector<4x16xf32>
    %20 = arith.mulf %15, %19 : vector<4x16xf32>
    %21 = math.exp %4 : vector<4x16xf32>
    %22 = vector.broadcast %10 : vector<4x1xf32> to vector<4x16xf32>
    %23 = arith.subf %2, %22 : vector<4x16xf32>
    %24 = arith.mulf %20, %23 : vector<4x16xf32>
    %cst_14 = arith.constant dense<0.000000e+00> : vector<4x16xf32>
    %25 = tpu.matmul %0, %24, %cst_14 {dimension_numbers = #tpu.dot_dimension_numbers<[1], [0], [0], [1], [0, 0, 1, 1], [], []>} : vector<4x4xf32>, vector<4x16xf32>, vector<4x16xf32> -> vector<4x16xf32>
    %26 = vector.broadcast %10 : vector<4x1xf32> to vector<4x16xf32>
    %27 = arith.addf %25, %26 : vector<4x16xf32>
    %28 = arith.subf %6, %27 : vector<4x16xf32>
    %c0_15 = arith.constant 0 : index
    %c0_16 = arith.constant 0 : index
    %c0_17 = arith.constant 0 : index
    %c0_18 = arith.constant 0 : index
    %29 = vector.load %arg3[%c0_15, %c0_16, %c0_17, %c0_18] : memref<1x3x4x16xf32, #tpu.memory_space<vmem>>, vector<1x1x4x16xf32>
    %30 = vector.shape_cast %29 : vector<1x1x4x16xf32> to vector<4x16xf32>
    %31 = vector.shape_cast %27 : vector<4x16xf32> to vector<1x1x4x16xf32>
    tpu.vector_store %arg3[%c0_15, %c0_16, %c0_17, %c0_18], %31 {strides = array<i32>} : memref<1x3x4x16xf32, #tpu.memory_space<vmem>>, vector<1x1x4x16xf32>,
    %c0_19 = arith.constant 0 : index
    %c1_20 = arith.constant 1 : index
    %c0_21 = arith.constant 0 : index
    %c0_22 = arith.constant 0 : index
    %32 = vector.load %arg3[%c0_19, %c1_20, %c0_21, %c0_22] : memref<1x3x4x16xf32, #tpu.memory_space<vmem>>, vector<1x1x4x16xf32>
    %33 = vector.shape_cast %32 : vector<1x1x4x16xf32> to vector<4x16xf32>
    %34 = vector.shape_cast %21 : vector<4x16xf32> to vector<1x1x4x16xf32>
    tpu.vector_store %arg3[%c0_19, %c1_20, %c0_21, %c0_22], %34 {strides = array<i32>} : memref<1x3x4x16xf32, #tpu.memory_space<vmem>>, vector<1x1x4x16xf32>,
    %c0_23 = arith.constant 0 : index
    %c2_24 = arith.constant 2 : index
    %c0_25 = arith.constant 0 : index
    %c0_26 = arith.constant 0 : index
    %35 = vector.load %arg3[%c0_23, %c2_24, %c0_25, %c0_26] : memref<1x3x4x16xf32, #tpu.memory_space<vmem>>, vector<1x1x4x16xf32>
    %36 = vector.shape_cast %35 : vector<1x1x4x16xf32> to vector<4x16xf32>
    %37 = vector.shape_cast %28 : vector<4x16xf32> to vector<1x1x4x16xf32>
    tpu.vector_store %arg3[%c0_23, %c2_24, %c0_25, %c0_26], %37 {strides = array<i32>} : memref<1x3x4x16xf32, #tpu.memory_space<vmem>>, vector<1x1x4x16xf32>,
    return
  }
  func.func @transform_0(%arg0: i32) -> (i32, i32, i32, i32) {
    %c0_i32 = arith.constant 0 : i32
    %c0_i32_0 = arith.constant 0 : i32
    %c0_i32_1 = arith.constant 0 : i32
    %c0_i32_2 = arith.constant 0 : i32
    return %arg0, %c0_i32, %c0_i32_0, %c0_i32_1 : i32, i32, i32, i32
  }
  func.func @transform_1(%arg0: i32) -> (i32, i32) {
    %c0_i32 = arith.constant 0 : i32
    %c0_i32_0 = arith.constant 0 : i32
    %c0_i32_1 = arith.constant 0 : i32
    return %c0_i32, %c0_i32_0 : i32, i32
  }
  func.func @transform_2(%arg0: i32) -> (i32, i32, i32, i32) {
    %c0_i32 = arith.constant 0 : i32
    %c0_i32_0 = arith.constant 0 : i32
    %c0_i32_1 = arith.constant 0 : i32
    %c0_i32_2 = arith.constant 0 : i32
    return %arg0, %c0_i32, %c0_i32_0, %c0_i32_1 : i32, i32, i32, i32
  }
}

</mosaic_0001>

<bundles_post_ra>
// kernel: tpu_custom_call.1
= control target key start
LH: loop header
LB: loop body
LE: loop exit
PB: predicated region body
PF: predicated region fallthrough
CT: control target
= control target key end

     0   :  { %7 = vsyncpa [#allocation3], 0  ;;  %s856_s0 = inlined_call_operand.hbm [shape: f32[2,3,4,16], index: 0, kind: input, shape index: {}]   ;;  %s857_s1 = inlined_call_operand.hbm [shape: f32[4,4], index: 1, kind: input, shape index: {}]   ;;  %s858_s2 = inlined_call_operand.hbm [shape: f32[2,3,4,16], index: 2, kind: output, shape index: {}]  }
   0x1   :  { %9 = vsyncpa [#allocation3 + $0x1], 0 }
   0x2   :  { %10 = vsyncpa [#allocation6], 0 }
   0x3   :  { %11 = vsyncpa [#allocation4], 0 }
   0x4   :  { %13 = vsyncpa [#allocation4 + $0x1], 0  ;;  %s641_s9 = smov 0   ;;  %s643_s10 = smov 0  }
   0x5   :  { %s645_s11 = smov 0   ;;  %s647_s12 = smov 0  }
   0x6 LB: > { %s662_s13 = sadd.s32 4294967295, %s615_s12   ;;  %s391_s14 = sadd.s32 4294967294, %s615_s12   ;;  %s615_s12 = sphi %s647_s12, %s883_s12   ;;  %s611_s11 = sphi %s645_s11, %s882_s11   ;;  %s607_s10 = sphi %s643_s10, %s881_s10   ;;  %s603_s9 = sphi %s641_s9, %s880_s9  }
   0x7   : > { %s666_s15 = sadd.s32 1, %s615_s12   ;;  %s26_s16 = sadd.s32 1, %s611_s11 }
   0x8   : > { %s23_s17 = ssub.s32 %s615_s12, %s666_s15  ;;  %p33_p0 = scmp.ne.s32.totalorder %s611_s11, %s607_s10 }
   0x9   : > { %p24_p1 = scmp.eq.s32.totalorder %s23_s17, 0  ;;  %p34_p2 = scmp.eq.s32.totalorder %s615_s12, 0 }
   0xa   : > { %p39_p3 = scmp.ne.s32.totalorder %s607_s10, %s603_s9  ;;  %p859_p4 = scmp.eq.s32.totalorder %s662_s13, 0 }
   0xb   : > { %s678_s18 = scalar_select %p24_p1, %s611_s11, %s26_s16  }
   0xc   : > { %p680_p5 = por %p34_p2, %p33_p0  ;;  %p686_p6 = por %p859_p4, %p39_p3 }
   0xd   : > { %p84_p7 = scmp.eq.s32.totalorder %s662_s13, 1  ;;  %p90_p8 = scmp.eq.s32.totalorder %s391_s14, 1 }
   0xe   : > { %s865_s20 = scalar_select %p686_p6, 1, 0 }
   0xf   : > { %p392_p9 = scmp.ge.s32.totalorder %s615_s12, 1  ;;  %p97_p10 = scmp.lt.s32.totalorder %s615_s12, 3 }
  0x10   : > { %p693_p11 = por %p84_p7, %p33_p0  ;;  %p697_p12 = por %p90_p8, %p39_p3 }
  0x11   : > { %p701_p13 = pnand %p392_p9, %p97_p10  ;;  %s617_s24 = smov [#allocation5]  }
  0x12   : > { %s866_s21 = scalar_select %p693_p11, 1, 0 }
  0x13   : > { %s867_s22 = scalar_select %p697_p12, 1, 0 }
  0x14   : > { %s868_s23 = scalar_select %p701_p13, 1, 0 }
  0x15   : > { %p426_p2 = pneg %p701_p13  ;;  %s110_s25 = sshll.u32 %s617_s24, 4  ;;  %s111_s25 = int_to_ptr.vmem [resolvable:$true] %s110_s25 }
  0x16   : > { %p439_p4 = scmp.lt.s32.totalorder %s615_s12, 2  ;;  %p869_p0 = scmp.eq.s32.totalorder %s662_s13, 0 }
  0x17   : > { %s121_s27 = sand.u32 1, %s611_s11   ;;  %s487_s4 = scalar_lea.hbm %s857_s1, 64 }
  0x18   : > { %p711_p7 = pnand %p426_p2, %p869_p0  ;;  %p718_p3 = pnand %p439_p4, %p680_p5 }
  0x19   : > { %s414_s29 = smul.u32 12, %s121_s27  ;;  %p488_p8 = scmp.ne.s32.totalorder %s857_s1, %s487_s4 }
  0x1a   : > { %s871_s28 = scalar_select %p718_p3, 1, 0 }
  0x1b   : > { %p489_p9 = pneg %p711_p7  ;;  %p494_p4 = scmp.lt.u32.totalorder %s487_s4, %s857_s1 }
  0x1d   : > { %p490_p10 = pnand %p489_p9, %p488_p8 }
  0x1f   : > { %p491_p2 = pneg %p490_p10 }
  0x21   : > { %p496_p5 = pnand %p494_p4, %p491_p2 }
  0x23   : > { %499 = shalt.err (!%p496_p5)
}
  0x24   : > { %s500_s14 = scalar_lea.vmem %s111_s25, 64  ;;  %p508_p11 = scmp.lt.s32.totalorder %s111_s25, %s111_s25 }
  0x25   : > { %p501_p0 = scmp.ne.s32.totalorder %s111_s25, %s500_s14  ;;  %p509_p6 = scmp.lt.s32.totalorder %s500_s14, %s500_s14 }
  0x27   : > { %p503_p1 = pnand %p501_p0, %p489_p9  ;;  %p510_p13 = por %p509_p6, %p508_p11 }
  0x29   : > { %p504_p12 = pneg %p503_p1 }
  0x2b   : > { %p511_p3 = pnand %p510_p13, %p504_p12 }
  0x2d   : > { %514 = shalt.err (!%p511_p3)
}
  0x2e   : > { %429 = dma.hbm_to_vmem [thread:$0]  (!%p711_p7), %s857_s1, 64, %s111_s25, [#allocation6]  }
  0x2f   : > { %s415_s19 = smul.u32 192, %s615_s12  ;;  %s125_s24 = scalar_lea.vmem [#allocation2], %s414_s29 }
  0x30   : > { %s132_s30 = sshll.u32 %s125_s24, 4  ;;  %s746_s26 = scalar_lea.sflag [#allocation3], %s121_s27  ;;  %s739_s30 = int_to_ptr.vmem [resolvable:$true] %s132_s30 }
  0x31   : > { %s744_s5 = scalar_lea.hbm %s856_s0, %s415_s19  ;;  %p872_p11 = scmp.ne.s32.totalorder %s871_s28, 0 }
  0x32   : > { %s515_s6 = scalar_lea.hbm %s744_s5, 192  ;;  %s520_s7 = scalar_lea.hbm %s856_s0, 384 }
  0x33   : > { %p516_p6 = scmp.ne.s32.totalorder %s744_s5, %s515_s6  ;;  %p517_p12 = pneg %p872_p11 }
  0x34   : > { %p521_p7 = scmp.lt.u32.totalorder %s744_s5, %s856_s0  ;;  %p522_p3 = scmp.lt.u32.totalorder %s520_s7, %s515_s6 }
  0x35   : > { %p518_p13 = pnand %p517_p12, %p516_p6  ;;  %p524_p9 = scmp.lt.u32.totalorder %s515_s6, %s744_s5 }
  0x36   : > { %p523_p8 = por %p522_p3, %p521_p7 }
  0x37   : > { %p519_p1 = pneg %p518_p13 }
  0x38   : > { %p525_p10 = por %p524_p9, %p523_p8 }
  0x3a   : > { %p526_p2 = pnand %p525_p10, %p519_p1 }
  0x3c   : > { %529 = shalt.err (!%p526_p2)
}
  0x3d   : > { %s530_s27 = scalar_lea.vmem %s739_s30, 192  ;;  %s618_s16 = smov [#allocation2]  }
  0x3e   : > { %p531_p4 = scmp.ne.s32.totalorder %s739_s30, %s530_s27  ;;  %s535_s17 = sshll.u32 %s618_s16, 4  ;;  %s536_s17 = int_to_ptr.vmem [resolvable:$false] %s535_s17 }
  0x3f   : > { %s537_s19 = scalar_lea.vmem %s536_s17, 384  ;;  %p538_p6 = scmp.lt.s32.totalorder %s739_s30, %s536_s17 }
  0x40   : > { %p533_p5 = pnand %p531_p4, %p517_p12  ;;  %p539_p13 = scmp.lt.s32.totalorder %s537_s19, %s530_s27 }
  0x42   : > { %p534_p0 = pneg %p533_p5  ;;  %p540_p7 = por %p539_p13, %p538_p6 }
  0x44   : > { %p541_p3 = pnand %p540_p7, %p534_p0 }
  0x46   : > { %544 = shalt.err (!%p541_p3)
}
  0x47   : > { %s619_s24 = smov 64   ;;  %s620_s3 = smov 4  }
  0x48   : > { %433 = dma.hbm_to_vmem [thread:$0]  (!%p872_p11), %s744_s5, 192, %s739_s30, %s746_s26, %s619_s24, %s619_s24, %s620_s3  }
  0x49   : > { %p873_p12 = scmp.ne.s32.totalorder %s868_s23, 0 }
  0x4a   : > { %s777_s4 = sand.u32 (!%p873_p12), 1, %s607_s10   ;;  %p874_p1 = scmp.ne.s32.totalorder (!%p873_p12), %s865_s20, 0 }
  0x4b   : > { %144 = sbr.rel (%p873_p12) target bundleno = 468 (0x1d4), region = 28  ;;  %s147_s25 = scalar_lea.sflag (!%p873_p12), [#allocation3], %s777_s4 }
  0x4c   : > { %s416_s6 = smul.u32 (!%p873_p12), 12, %s777_s4 }
  0x4e   : > { %s781_s29 = scalar_lea.vmem (!%p873_p12), [#allocation2], %s416_s6 }
  0x52   : > { %590 = dma.done.wait (%p874_p1), %s147_s25, 192  }
  0x53   : > { %592 = vsyncadd (%p874_p1), %s147_s25, 4294967104  ;;  %p875_p11 = scmp.eq.s32.totalorder %s662_s13, 0 }
  0x55   : > { %594 = dma.done.wait (%p875_p11), [#allocation6], 64   ;;  %p876_p8 = pmov %p875_p11 }
  0x56   : > { %vm181_vm0 = vcmask 125952   ;;  %v176_v0 = vld [vmem:[%s781_s29] sm:$0xf]  ;;  %v398_v2 = vld [vmem:[%s781_s29 + $0x4] sm:$0xf]  ;;  %v621_v5 = vmov 0.0  }
  0x57   : > { %596 = vsyncadd (%p876_p8), [#allocation6], 4294967232  ;;  %v182_v1 = vsel %vm181_vm0, %v176_v0, 0.0  ;;  %v206_v3 = vmul.f32 1.442695, %v398_v2  ;;  %409 = vmatprep.subr.mxu0 %v621_v5  ;;  %vm622_vm1 = vmmov 0  }
  0x58   : > { %183 = vadd.xlane.f32.xlu0 %v182_v1  ;;  %411 = vmatprep.mubr.msk.f32.mxu0 %vm622_vm1, %v621_v5  ;;  %s794_s20 = scalar_lea.vmem [#allocation7], %s416_s6  ;;  %v187_v6 = vsel %vm181_vm0, %v398_v2, -inf  ;;  %vm214_vm2 = vcmask 1043456   ;;  %v175_v29 = vld [vmem:[#allocation5] sm:$0xf]  ;;  %vm210_vm3 = vcmask 31744  }
  0x59   : > { %481 = vpow2.f32 %v206_v3  ;;  %v188_v7 = vrot.slane %v187_v6, 4  ;;  %s308_s23 = sshll.u32 %s794_s20, 4  ;;  %s417_s28 = smul.u32 192, %s662_s13  ;;  %v399_v30 = vld [vmem:[%s781_s29 + $0x8] sm:$0xf]  ;;  %s803_s23 = int_to_ptr.vmem [resolvable:$true] %s308_s23 }
  0x5a   : > { %s295_s13 = scalar_lea.sflag [#allocation4], %s777_s4  ;;  %s545_s7 = scalar_lea.vmem %s803_s23, 192 }
  0x5b   : > { %v189_v8 = vmax.f32 %v187_v6, %v188_v7  ;;  %s808_s26 = scalar_lea.hbm %s858_s2, %s417_s28  ;;  %p546_p9 = scmp.ne.s32.totalorder %s803_s23, %s545_s7 }
  0x5c   : > { %p877_p10 = scmp.ne.s32.totalorder %s866_s21, 0  ;;  %s623_s8 = smov [#allocation7]  }
  0x5d   : > { %v190_v9 = vrot.slane %v189_v8, 2  ;;  %s549_s14 = sshll.u32 %s623_s8, 4  ;;  %s550_s14 = int_to_ptr.vmem [resolvable:$false] %s549_s14 }
  0x5e   : > { %p547_p2 = pnand %p546_p9, %p877_p10  ;;  %s551_s27 = scalar_lea.vmem %s550_s14, 384 }
  0x5f   : > { %v191_v10 = vmax.f32 %v189_v8, %v190_v9  ;;  %p552_p5 = scmp.lt.s32.totalorder %s803_s23, %s550_s14  ;;  %p553_p0 = scmp.lt.s32.totalorder %s551_s27, %s545_s7 }
  0x60   : > { %p548_p4 = pneg %p547_p2 }
  0x61   : > { %v192_v11 = vrot.slane %v191_v10, 1  ;;  %p554_p6 = por %p553_p0, %p552_p5 }
  0x63   : > { %v482_v4 = vpop.eup %481  ;;  %v193_v12 = vmax.f32 %v191_v10, %v192_v11  ;;  %p555_p13 = pnand %p554_p6, %p548_p4 }
  0x64   : > { %402 = vst.msk [vmem:[%s794_s20 + $0x4] sm:$0xf] %vm181_vm0, %v482_v4 }
  0x65   : > { %v194_v13 = vsub.f32 %v398_v2, %v193_v12 }
  0x67   : > { %v195_v14 = vmul.f32 1.442695, %v194_v13 }
  0x69   : > { %483 = vpow2.f32 %v195_v14 }
  0x73   : > { %v484_v15 = vpop.eup %483 }
  0x74   : > { %v197_v16 = vsel %vm181_vm0, %v484_v15, 0.0 }
  0x75   : > { %v198_v17 = vrot.slane %v197_v16, 4 }
  0x77   : > { %v199_v18 = vadd.f32 %v198_v17, %v197_v16 }
  0x79   : > { %v200_v19 = vrot.slane %v199_v18, 2 }
  0x7b   : > { %v201_v20 = vadd.f32 %v200_v19, %v199_v18 }
  0x7d   : > { %v202_v21 = vrot.slane %v201_v20, 1 }
  0x7f   : > { %v203_v22 = vadd.f32 %v202_v21, %v201_v20 }
  0x81   : > { %485 = vrcp.f32 %v203_v22 }
  0x8b   : > { %v486_v23 = vpop.eup %485 }
  0x8c   : > { %v205_v26 = vmul.f32 %v486_v23, %v484_v15 }
  0xe5   : > { %v184_v24 = vpop.xlane.xlu0 %183 }
  0xe6   : > { %v186_v25 = vmul.f32 0.0625, %v184_v24 }
  0xe8   : > { %v208_v27 = vsub.f32 %v176_v0, %v186_v25 }
  0xea   : > { %v209_v28 = vmul.f32 %v208_v27, %v205_v26 }
  0xec   : > { %410 = vmatpush3.msk.msra.mxu0 %vm214_vm2, %v209_v28 }
  0xed   : > { %412 = vmatmul.mubr.msk.f32.vlgmr.msra.gmra.mrb[0].mxu0 %vm210_vm3, %v175_v29 }
 0x1c0   : > { %v284_v31 = vpop.f32.mrb[0].mxu0 }
 0x1c1   : > { %v285_v32 = vadd.f32 %v284_v31, %v186_v25  ;;  %v413_v33 = vpop.f32.mrb[1].mxu0 }
 0x1c3   : > { %v288_v34 = vsub.f32 %v399_v30, %v285_v32  ;;  %289 = vst.msk [vmem:[%s794_s20] sm:$0xf] %vm181_vm0, %v285_v32 }
 0x1c5   : > { %403 = vst.msk [vmem:[%s794_s20 + $0x8] sm:$0xf] %vm181_vm0, %v288_v34 }
 0x1c6   : > { %558 = shalt.err (!%p555_p13)
}
 0x1c7   : > { %s559_s16 = scalar_lea.hbm %s808_s26, 192  ;;  %s563_s24 = scalar_lea.hbm %s858_s2, 384 }
 0x1c8   : > { %p560_p7 = scmp.ne.s32.totalorder %s808_s26, %s559_s16  ;;  %p564_p1 = scmp.lt.u32.totalorder %s808_s26, %s858_s2 }
 0x1c9   : > { %p565_p11 = scmp.lt.u32.totalorder %s563_s24, %s559_s16  ;;  %p567_p9 = scmp.lt.u32.totalorder %s559_s16, %s808_s26 }
 0x1ca   : > { %p561_p3 = pnand %p560_p7, %p877_p10 }
 0x1cb   : > { %p566_p8 = por %p565_p11, %p564_p1 }
 0x1cc   : > { %p562_p12 = pneg %p561_p3 }
 0x1cd   : > { %p568_p2 = por %p567_p9, %p566_p8 }
 0x1cf   : > { %p569_p4 = pnand %p568_p2, %p562_p12 }
 0x1d1   : > { %572 = shalt.err (!%p569_p4)
}
 0x1d2   : > { %s624_s25 = smov 64   ;;  %s625_s29 = smov 4  }
 0x1d3   : > { %424 = dma.vmem_to_hbm [thread:$0]  (%p877_p10), %s803_s23, 192, %s808_s26, %s295_s13, %s624_s25, %s624_s25, %s625_s29  }
 0x1d4 PF: > { %s323_s20 = sand.u32 1, %s603_s9   ;;  %p878_p5 = scmp.ne.s32.totalorder %s867_s22, 0 }
 0x1d5   : > { %p879_p0 = scmp.ge.s32.totalorder %s615_s12, 2  ;;  %s324_s28 = scalar_lea.sflag [#allocation4], %s323_s20 }
 0x1d7   : > { %p435_p6 = pnand %p879_p0, %p878_p5 }
 0x1d9   : > { %598 = dma.done.wait (!%p435_p6), %s324_s28, 192  }
 0x1da   : > { %600 = vsyncadd (!%p435_p6), %s324_s28, 4294967104  ;;  %p16_p13 = scmp.ge.s32.totalorder %s666_s15, 4   ;;  %s880_s9 = smov %s607_s10 }
 0x1db   : > { %s881_s10 = smov %s611_s11  ;;  %s882_s11 = smov %s678_s18 }
 0x1dc   : > { %s883_s12 = smov %s666_s15  ;;  %18 = sbr.rel (!%p16_p13) target bundleno = 6 (0x6), region = 81 }
 0x1e3   :  { %329 = vsyncpa [#allocation3], 1 }
 0x1e4   :  { %331 = vsyncpa [#allocation3 + $0x1], 1 }
 0x1e5   :  { %332 = vsyncpa [#allocation6], 1 }
 0x1e6   :  { %333 = vsyncpa [#allocation4], 1 }
 0x1e7   :  { %335 = vsyncpa [#allocation4 + $0x1], 1 }

</bundles_post_ra>
